<compile_context>
chip_gen: v7x
topology: tpu7x:2x2x1
jax: 0.10.0
libtpu: 0.0.40
codegen_flags: <defaults>
</compile_context>

<pallas_src>
import functools

import jax
import jax.numpy as jnp
from jax import lax
from jax.experimental import pallas as pl
from jax.experimental.pallas import tpu as pltpu


def _conv_bn_relu_kernel(w_ref, lhs_ref, bias_ref, o_ref, *, shifts, halo, m_out):
    # w_ref    : (9, cout_blk, Cin)        bf16  BN-scale-folded weight, one (dy,dx) tap per row 0
    # lhs_ref  : (Cin, m_out + 2*halo)     bf16  padded, flattened, halo'd activation (resident)
    # bias_ref : (cout_blk, 1)             f32   folded BN bias
    # o_ref    : (cout_blk, m_out)         f32   lane-dense output block
    x = lhs_ref[...]
    w = w_ref[...]
    acc = None
    for t, s in enumerate(shifts):                    # statically unrolled: 9 shifted K=Cin dots
        start = halo + s                              # static Python int
        cols = x[:, start:start + m_out]              # (Cin, m_out) shifted view
        d = jnp.dot(w[t], cols, preferred_element_type=jnp.float32)
        acc = d if acc is None else acc + d
    o_ref[...] = jnp.maximum(acc + bias_ref[...], 0.0).astype(o_ref.dtype)


def _pick_cout_block(cout):
    # Prefer >=2 parallel grid steps (v7x has 2 TensorCores) with sublane-aligned blocks.
    divs = [d for d in range(8, cout, 8) if cout % d == 0]
    return max(divs) if divs else cout


def _conv_bn_relu_pallas(lhs_ext, w9, bias, *, m_out, halo, shifts):
    cin, wext = lhs_ext.shape
    _, cout, _ = w9.shape
    blk = _pick_cout_block(cout)
    grid = (cout // blk,)
    kernel = functools.partial(_conv_bn_relu_kernel, shifts=shifts, halo=halo, m_out=m_out)
    return pl.pallas_call(
        kernel,
        out_shape=jax.ShapeDtypeStruct((cout, m_out), jnp.float32),
        grid_spec=pltpu.PrefetchScalarGridSpec(
            num_scalar_prefetch=0,
            grid=grid,
            in_specs=[
                pl.BlockSpec((9, blk, cin), lambda j: (0, j, 0)),   # per-Cout-block weights
                pl.BlockSpec((cin, wext), lambda j: (0, 0)),        # activation: fetched once, resident
                pl.BlockSpec((blk, 1), lambda j: (j, 0)),           # folded BN bias
            ],
            out_specs=pl.BlockSpec((blk, m_out), lambda j: (j, 0)),
        ),
        compiler_params=pltpu.CompilerParams(
            dimension_semantics=("parallel",),
            vmem_limit_bytes=32 * 1024 * 1024,
        ),
    )(w9, lhs_ext, bias)


def psi(x_nchw, block_size):
    # Space-to-depth exactly as the PyTorch psi module (used by the reference check).
    bs = block_size
    b, c, h, w = x_nchw.shape
    assert h % bs == 0 and w % bs == 0
    x1 = x_nchw.reshape(b, c, h // bs, bs, w // bs, bs)
    x2 = jnp.transpose(x1, (0, 3, 5, 1, 2, 4))
    return x2.reshape(b, bs * bs * c, h // bs, w // bs)


def block_conv_forward(x_nchw, params, downsample=True, batchn=True):
    """Reproduces block_conv.forward (eval-mode BN).  Input / output are NCHW like PyTorch."""
    conv_w = params["conv_w"]                       # (Cout, Cin, 3, 3)  OIHW
    cout, cin = conv_w.shape[0], conv_w.shape[1]

    if downsample:
        b, c, hin, win = x_nchw.shape
        bs = 2
        assert hin % bs == 0 and win % bs == 0
        h, w = hin // bs, win // bs
        assert cin == bs * bs * c
        # psi composed with channel-major relayout in ONE transpose; H,W stay minor (cheap).
        x1 = x_nchw.reshape(b, c, h, bs, w, bs)
        xc = jnp.transpose(x1, (3, 5, 1, 0, 2, 4)).reshape(cin, b, h, w)
    else:
        c_in_full, b = x_nchw.shape[1], x_nchw.shape[0]
        h, w = x_nchw.shape[2], x_nchw.shape[3]
        assert cin == c_in_full
        xc = jnp.transpose(x_nchw, (1, 0, 2, 3))    # (Cin, B, H, W) major-axis permute only

    hp, wp = h + 2, w + 2
    halo = wp + 1                                   # max |tap shift| on the flattened axis
    m_valid = b * hp * wp
    m_out = ((m_valid + 127) // 128) * 128          # lane-dense (multiple-of-128) output width

    # Spatially zero-padded, flattened, halo'd activation slab (single 1x HBM read in kernel).
    xpad = jnp.pad(xc, ((0, 0), (0, 0), (1, 1), (1, 1)))
    flat = xpad.reshape(cin, m_valid)
    lhs_ext = jnp.pad(flat, ((0, 0), (halo, (m_out - m_valid) + halo))).astype(jnp.bfloat16)

    if batchn:
        # TODO(synk): training-mode BatchNorm (per-batch statistics + running-stat updates)
        # is not implemented; this is the inference / running-stats form folded into the conv.
        eps = 1e-5
        scale = params["gamma"] / jnp.sqrt(params["running_var"] + eps)
        bias = params["beta"] - params["running_mean"] * scale
    else:
        scale = jnp.ones((cout,), jnp.float32)
        bias = jnp.zeros((cout,), jnp.float32)

    # Fold BN scale into the weight; arrange one (dy, dx) tap per leading index: (9, Cout, Cin).
    w9 = jnp.transpose(conv_w * scale[:, None, None, None], (2, 3, 0, 1))
    w9 = w9.reshape(9, cout, cin).astype(jnp.bfloat16)

    # Tap (dy, dx) reads flattened-padded position m + (dy-1)*Wp + (dx-1).
    shifts = tuple((dy - 1) * wp + (dx - 1) for dy in range(3) for dx in range(3))

    out_flat = _conv_bn_relu_pallas(
        lhs_ext, w9, bias.reshape(cout, 1).astype(jnp.float32),
        m_out=m_out, halo=halo, shifts=shifts)

    # Drop lane padding and the spatial padding positions, return NCHW like PyTorch.
    out = out_flat[:, :m_valid].reshape(cout, b, hp, wp)[:, :, 1:1 + h, 1:1 + w]
    return jnp.transpose(out, (1, 0, 2, 3))


def _reference_forward_matched(x_nchw, params, downsample=True):
    """lax.conv reference with the same bf16-input / f32-accumulate numerics as the kernel."""
    if downsample:
        x_nchw = psi(x_nchw, 2)
    eps = 1e-5
    scale = params["gamma"] / jnp.sqrt(params["running_var"] + eps)
    bias = params["beta"] - params["running_mean"] * scale
    wq = (params["conv_w"] * scale[:, None, None, None]).astype(jnp.bfloat16)
    y = lax.conv_general_dilated(
        x_nchw.astype(jnp.bfloat16), wq, window_strides=(1, 1), padding=((1, 1), (1, 1)),
        dimension_numbers=("NCHW", "OIHW", "NCHW"),
        preferred_element_type=jnp.float32)
    y = y + bias[None, :, None, None]
    return jnp.maximum(y, 0.0)


if __name__ == "__main__":
    key = jax.random.PRNGKey(0)
    kx, kw, kg, kb, km, kv = jax.random.split(key, 6)

    # Module config: downsample=True, so the conv sees in_planes = 4 * C = 16 channels.
    B, C, Hin, Win = 2, 4, 16, 16
    in_planes, planes = 16, 32

    x = jax.random.normal(kx, (B, C, Hin, Win), dtype=jnp.float32)
    params = {
        "conv_w": jax.random.normal(kw, (planes, in_planes, 3, 3), jnp.float32) * 0.1,
        "gamma": 1.0 + 0.1 * jax.random.normal(kg, (planes,), jnp.float32),
        "beta": 0.1 * jax.random.normal(kb, (planes,), jnp.float32),
        "running_mean": 0.1 * jax.random.normal(km, (planes,), jnp.float32),
        "running_var": jnp.abs(jax.random.normal(kv, (planes,), jnp.float32)) + 0.5,
    }

    fwd = jax.jit(lambda xx, pp: block_conv_forward(xx, pp, downsample=True, batchn=True))
    out = jax.block_until_ready(fwd(x, params))
    assert out.shape == (B, planes, Hin // 2, Win // 2), out.shape

    # bf16-matched reference (kernel uses bf16 MXU inputs with f32 accumulation, per review).
    ref = jax.block_until_ready(_reference_forward_matched(x, params, downsample=True))
    max_err = float(jnp.max(jnp.abs(out - ref)))
    assert jnp.allclose(out, ref, atol=2e-3, rtol=2e-3), max_err
    print("KERNEL_OK")
</pallas_src>

<mosaic_0001>
module attributes {stable_mosaic.version = 11 : i64} {
  func.func @_conv_bn_relu_kernel(%arg0: i32, %arg1: memref<9x16x16xbf16, #tpu.memory_space<vmem>>, %arg2: memref<16x278xbf16, #tpu.memory_space<vmem>>, %arg3: memref<16x1xf32, #tpu.memory_space<vmem>>, %arg4: memref<16x256xf32, #tpu.memory_space<vmem>>) attributes {dimension_semantics = [#tpu.dimension_semantics<parallel>], iteration_bounds = array<i64: 2>, scalar_prefetch = 0 : i64, scratch_operands = 0 : i64, tpu.core_type = #tpu.core_type<tc>, window_params = [{transform_indices = @transform_0, window_bounds = array<i64: 9, 16, 16>}, {pipeline_mode = #tpu.pipeline_mode<synchronous>, transform_indices = @transform_1, window_bounds = array<i64: 16, 278>}, {transform_indices = @transform_2, window_bounds = array<i64: 16, 1>}, {transform_indices = @transform_3, window_bounds = array<i64: 16, 256>}]} {
    %c0 = arith.constant 0 : index
    %c0_0 = arith.constant 0 : index
    %0 = vector.load %arg2[%c0, %c0_0] : memref<16x278xbf16, #tpu.memory_space<vmem>>, vector<16x278xbf16>
    %c0_1 = arith.constant 0 : index
    %c0_2 = arith.constant 0 : index
    %c0_3 = arith.constant 0 : index
    %1 = vector.load %arg1[%c0_1, %c0_2, %c0_3] : memref<9x16x16xbf16, #tpu.memory_space<vmem>>, vector<9x16x16xbf16>
    %2 = vector.extract_strided_slice %0 {offsets = [0, 0], sizes = [16, 256], strides = [1, 1]} : vector<16x278xbf16> to vector<16x256xbf16>
    %3 = vector.extract_strided_slice %1 {offsets = [0, 0, 0], sizes = [1, 16, 16], strides = [1, 1, 1]} : vector<9x16x16xbf16> to vector<1x16x16xbf16>
    %4 = vector.shape_cast %3 : vector<1x16x16xbf16> to vector<16x16xbf16>
    %cst = arith.constant dense<0.000000e+00> : vector<16x256xf32>
    %5 = tpu.matmul %4, %2, %cst {dimension_numbers = #tpu.dot_dimension_numbers<[1], [0], [0], [1], [0, 0, 1, 1], [], []>} : vector<16x16xbf16>, vector<16x256xbf16>, vector<16x256xf32> -> vector<16x256xf32>
    %6 = vector.extract_strided_slice %0 {offsets = [0, 1], sizes = [16, 256], strides = [1, 1]} : vector<16x278xbf16> to vector<16x256xbf16>
    %7 = vector.extract_strided_slice %1 {offsets = [1, 0, 0], sizes = [1, 16, 16], strides = [1, 1, 1]} : vector<9x16x16xbf16> to vector<1x16x16xbf16>
    %8 = vector.shape_cast %7 : vector<1x16x16xbf16> to vector<16x16xbf16>
    %cst_4 = arith.constant dense<0.000000e+00> : vector<16x256xf32>
    %9 = tpu.matmul %8, %6, %cst_4 {dimension_numbers = #tpu.dot_dimension_numbers<[1], [0], [0], [1], [0, 0, 1, 1], [], []>} : vector<16x16xbf16>, vector<16x256xbf16>, vector<16x256xf32> -> vector<16x256xf32>
    %10 = arith.addf %5, %9 : vector<16x256xf32>
    %11 = vector.extract_strided_slice %0 {offsets = [0, 2], sizes = [16, 256], strides = [1, 1]} : vector<16x278xbf16> to vector<16x256xbf16>
    %12 = vector.extract_strided_slice %1 {offsets = [2, 0, 0], sizes = [1, 16, 16], strides = [1, 1, 1]} : vector<9x16x16xbf16> to vector<1x16x16xbf16>
    %13 = vector.shape_cast %12 : vector<1x16x16xbf16> to vector<16x16xbf16>
    %cst_5 = arith.constant dense<0.000000e+00> : vector<16x256xf32>
    %14 = tpu.matmul %13, %11, %cst_5 {dimension_numbers = #tpu.dot_dimension_numbers<[1], [0], [0], [1], [0, 0, 1, 1], [], []>} : vector<16x16xbf16>, vector<16x256xbf16>, vector<16x256xf32> -> vector<16x256xf32>
    %15 = arith.addf %10, %14 : vector<16x256xf32>
    %16 = vector.extract_strided_slice %0 {offsets = [0, 10], sizes = [16, 256], strides = [1, 1]} : vector<16x278xbf16> to vector<16x256xbf16>
    %17 = vector.extract_strided_slice %1 {offsets = [3, 0, 0], sizes = [1, 16, 16], strides = [1, 1, 1]} : vector<9x16x16xbf16> to vector<1x16x16xbf16>
    %18 = vector.shape_cast %17 : vector<1x16x16xbf16> to vector<16x16xbf16>
    %cst_6 = arith.constant dense<0.000000e+00> : vector<16x256xf32>
    %19 = tpu.matmul %18, %16, %cst_6 {dimension_numbers = #tpu.dot_dimension_numbers<[1], [0], [0], [1], [0, 0, 1, 1], [], []>} : vector<16x16xbf16>, vector<16x256xbf16>, vector<16x256xf32> -> vector<16x256xf32>
    %20 = arith.addf %15, %19 : vector<16x256xf32>
    %21 = vector.extract_strided_slice %0 {offsets = [0, 11], sizes = [16, 256], strides = [1, 1]} : vector<16x278xbf16> to vector<16x256xbf16>
    %22 = vector.extract_strided_slice %1 {offsets = [4, 0, 0], sizes = [1, 16, 16], strides = [1, 1, 1]} : vector<9x16x16xbf16> to vector<1x16x16xbf16>
    %23 = vector.shape_cast %22 : vector<1x16x16xbf16> to vector<16x16xbf16>
    %cst_7 = arith.constant dense<0.000000e+00> : vector<16x256xf32>
    %24 = tpu.matmul %23, %21, %cst_7 {dimension_numbers = #tpu.dot_dimension_numbers<[1], [0], [0], [1], [0, 0, 1, 1], [], []>} : vector<16x16xbf16>, vector<16x256xbf16>, vector<16x256xf32> -> vector<16x256xf32>
    %25 = arith.addf %20, %24 : vector<16x256xf32>
    %26 = vector.extract_strided_slice %0 {offsets = [0, 12], sizes = [16, 256], strides = [1, 1]} : vector<16x278xbf16> to vector<16x256xbf16>
    %27 = vector.extract_strided_slice %1 {offsets = [5, 0, 0], sizes = [1, 16, 16], strides = [1, 1, 1]} : vector<9x16x16xbf16> to vector<1x16x16xbf16>
    %28 = vector.shape_cast %27 : vector<1x16x16xbf16> to vector<16x16xbf16>
    %cst_8 = arith.constant dense<0.000000e+00> : vector<16x256xf32>
    %29 = tpu.matmul %28, %26, %cst_8 {dimension_numbers = #tpu.dot_dimension_numbers<[1], [0], [0], [1], [0, 0, 1, 1], [], []>} : vector<16x16xbf16>, vector<16x256xbf16>, vector<16x256xf32> -> vector<16x256xf32>
    %30 = arith.addf %25, %29 : vector<16x256xf32>
    %31 = vector.extract_strided_slice %0 {offsets = [0, 20], sizes = [16, 256], strides = [1, 1]} : vector<16x278xbf16> to vector<16x256xbf16>
    %32 = vector.extract_strided_slice %1 {offsets = [6, 0, 0], sizes = [1, 16, 16], strides = [1, 1, 1]} : vector<9x16x16xbf16> to vector<1x16x16xbf16>
    %33 = vector.shape_cast %32 : vector<1x16x16xbf16> to vector<16x16xbf16>
    %cst_9 = arith.constant dense<0.000000e+00> : vector<16x256xf32>
    %34 = tpu.matmul %33, %31, %cst_9 {dimension_numbers = #tpu.dot_dimension_numbers<[1], [0], [0], [1], [0, 0, 1, 1], [], []>} : vector<16x16xbf16>, vector<16x256xbf16>, vector<16x256xf32> -> vector<16x256xf32>
    %35 = arith.addf %30, %34 : vector<16x256xf32>
    %36 = vector.extract_strided_slice %0 {offsets = [0, 21], sizes = [16, 256], strides = [1, 1]} : vector<16x278xbf16> to vector<16x256xbf16>
    %37 = vector.extract_strided_slice %1 {offsets = [7, 0, 0], sizes = [1, 16, 16], strides = [1, 1, 1]} : vector<9x16x16xbf16> to vector<1x16x16xbf16>
    %38 = vector.shape_cast %37 : vector<1x16x16xbf16> to vector<16x16xbf16>
    %cst_10 = arith.constant dense<0.000000e+00> : vector<16x256xf32>
    %39 = tpu.matmul %38, %36, %cst_10 {dimension_numbers = #tpu.dot_dimension_numbers<[1], [0], [0], [1], [0, 0, 1, 1], [], []>} : vector<16x16xbf16>, vector<16x256xbf16>, vector<16x256xf32> -> vector<16x256xf32>
    %40 = arith.addf %35, %39 : vector<16x256xf32>
    %41 = vector.extract_strided_slice %0 {offsets = [0, 22], sizes = [16, 256], strides = [1, 1]} : vector<16x278xbf16> to vector<16x256xbf16>
    %42 = vector.extract_strided_slice %1 {offsets = [8, 0, 0], sizes = [1, 16, 16], strides = [1, 1, 1]} : vector<9x16x16xbf16> to vector<1x16x16xbf16>
    %43 = vector.shape_cast %42 : vector<1x16x16xbf16> to vector<16x16xbf16>
    %cst_11 = arith.constant dense<0.000000e+00> : vector<16x256xf32>
    %44 = tpu.matmul %43, %41, %cst_11 {dimension_numbers = #tpu.dot_dimension_numbers<[1], [0], [0], [1], [0, 0, 1, 1], [], []>} : vector<16x16xbf16>, vector<16x256xbf16>, vector<16x256xf32> -> vector<16x256xf32>
    %45 = arith.addf %40, %44 : vector<16x256xf32>
    %c0_12 = arith.constant 0 : index
    %c0_13 = arith.constant 0 : index
    %46 = vector.load %arg3[%c0_12, %c0_13] : memref<16x1xf32, #tpu.memory_space<vmem>>, vector<16x1xf32>
    %47 = vector.broadcast %46 : vector<16x1xf32> to vector<16x256xf32>
    %48 = arith.addf %45, %47 : vector<16x256xf32>
    %cst_14 = arith.constant 0.000000e+00 : f32
    %49 = vector.broadcast %cst_14 : f32 to vector<16x256xf32>
    %50 = arith.maximumf %48, %49 : vector<16x256xf32>
    %c0_15 = arith.constant 0 : index
    %c0_16 = arith.constant 0 : index
    %51 = vector.load %arg4[%c0_15, %c0_16] : memref<16x256xf32, #tpu.memory_space<vmem>>, vector<16x256xf32>
    tpu.vector_store %arg4[%c0_15, %c0_16], %50 {strides = array<i32>} : memref<16x256xf32, #tpu.memory_space<vmem>>, vector<16x256xf32>,
    return
  }
  func.func @transform_0(%arg0: i32) -> (i32, i32, i32) {
    %c0_i32 = arith.constant 0 : i32
    %c0_i32_0 = arith.constant 0 : i32
    %c0_i32_1 = arith.constant 0 : i32
    return %c0_i32, %arg0, %c0_i32_0 : i32, i32, i32
  }
  func.func @transform_1(%arg0: i32) -> (i32, i32) {
    %c0_i32 = arith.constant 0 : i32
    %c0_i32_0 = arith.constant 0 : i32
    %c0_i32_1 = arith.constant 0 : i32
    return %c0_i32, %c0_i32_0 : i32, i32
  }
  func.func @transform_2(%arg0: i32) -> (i32, i32) {
    %c0_i32 = arith.constant 0 : i32
    %c0_i32_0 = arith.constant 0 : i32
    return %arg0, %c0_i32 : i32, i32
  }
  func.func @transform_3(%arg0: i32) -> (i32, i32) {
    %c0_i32 = arith.constant 0 : i32
    %c0_i32_0 = arith.constant 0 : i32
    return %arg0, %c0_i32 : i32, i32
  }
}

</mosaic_0001>

<bundles_post_ra>
// kernel: _lambda_.1
= control target key start
LH: loop header
LB: loop body
LE: loop exit
PB: predicated region body
PF: predicated region fallthrough
CT: control target
= control target key end

     0   :  { %s1193_s12 = smov 0   ;;  %s1195_s13 = smov 0   ;;  %s1318_s0 = inlined_call_operand.vmem [shape: bf16[9,32,16], index: 0, kind: input, shape index: {}]   ;;  %s1319_s1 = inlined_call_operand.vmem [shape: bf16[16,278], index: 1, kind: input, shape index: {}]   ;;  %s1320_s2 = inlined_call_operand.vmem [shape: f32[32,1], index: 2, kind: input, shape index: {}]   ;;  %s1321_s3 = inlined_call_operand.vmem [shape: f32[32,256], index: 3, kind: output, shape index: {}]  }
   0x1   :  { %s1197_s14 = smov 0  }
   0x2 LB: > { %s1021_s15 = sadd.s32 4294967295, %s1162_s14   ;;  %s1210_s16 = sadd.s32 1, %s1162_s14   ;;  %s1162_s14 = sphi %s1197_s14, %s1324_s14   ;;  %s1158_s13 = sphi %s1195_s13, %s1323_s13   ;;  %s1154_s12 = sphi %s1193_s12, %s1322_s12  }
   0x3   : > { %s17_s17 = ssub.s32 %s1162_s14, %s1210_s16  ;;  %s20_s18 = sadd.s32 1, %s1158_s13 }
   0x4   : > { %p18_p0 = scmp.eq.s32.totalorder %s17_s17, 0  ;;  %p27_p1 = scmp.ne.s32.totalorder %s1158_s13, %s1154_s12 }
   0x5   : > { %p28_p2 = scmp.eq.s32.totalorder %s1162_s14, 0  ;;  %p1024_p4 = scmp.ge.s32.totalorder %s1162_s14, 2 }
   0x6   : > { %s1219_s19 = scalar_select %p18_p0, %s1158_s13, %s20_s18  }
   0x7   : > { %p29_p3 = por %p28_p2, %p27_p1  ;;  %129 = sbr.rel (%p1024_p4) target bundleno = 23 (0x17), region = 20 }
   0xe   : > { %132 = sbr.rel (!%p29_p3) target bundleno = 23 (0x17), region = 24  ;;  %s134_s20 = sand.u32 (%p29_p3), 1, %s1158_s13  }
   0xf   : > { %s1056_s21 = sshll.u32 (%p29_p3), %s1162_s14, 3  ;;  %s1090_s22 = smul.u32 (%p29_p3), 72, %s134_s20 }
  0x10   : > { %s139_s25 = scalar_lea.vmem (%p29_p3), %s1318_s0, %s1056_s21 }
  0x11   : > { %v155_v0 = vld [vmem:[%s139_s25] sm:$0xff] (%p29_p3)   ;;  %v159_v1 = vld [vmem:[%s139_s25 + $0x10] sm:$0xff] (%p29_p3)   ;;  %s136_s26 = scalar_lea.vmem (%p29_p3), [#allocation2], %s1090_s22 }
  0x12   : > { %v163_v2 = vld [vmem:[%s139_s25 + $0x20] sm:$0xff] (%p29_p3)   ;;  %v167_v3 = vld [vmem:[%s139_s25 + $0x30] sm:$0xff] (%p29_p3)   ;;  %156 = vst [vmem:[%s136_s26] sm:$0xff] (%p29_p3), %v155_v0   ;;  %160 = vst [vmem:[%s136_s26 + $0x8] sm:$0xff] (%p29_p3), %v159_v1  }
  0x13   : > { %v171_v4 = vld [vmem:[%s139_s25 + $0x40] sm:$0xff] (%p29_p3)   ;;  %v175_v5 = vld [vmem:[%s139_s25 + $0x50] sm:$0xff] (%p29_p3)   ;;  %164 = vst [vmem:[%s136_s26 + $0x10] sm:$0xff] (%p29_p3), %v163_v2   ;;  %168 = vst [vmem:[%s136_s26 + $0x18] sm:$0xff] (%p29_p3), %v167_v3  }
  0x14   : > { %172 = vst [vmem:[%s136_s26 + $0x20] sm:$0xff] (%p29_p3), %v171_v4   ;;  %176 = vst [vmem:[%s136_s26 + $0x28] sm:$0xff] (%p29_p3), %v175_v5   ;;  %v179_v6 = vld [vmem:[%s139_s25 + $0x60] sm:$0xff] (%p29_p3)   ;;  %v183_v7 = vld [vmem:[%s139_s25 + $0x70] sm:$0xff] (%p29_p3)  }
  0x15   : > { %v187_v8 = vld [vmem:[%s139_s25 + $0x80] sm:$0xff]   ;;  %180 = vst [vmem:[%s136_s26 + $0x30] sm:$0xff] %v179_v6   ;;  %184 = vst [vmem:[%s136_s26 + $0x38] sm:$0xff] %v183_v7  }
  0x16   : > { %188 = vst [vmem:[%s136_s26 + $0x40] sm:$0xff] %v187_v8  }
  0x17 PF: > { %p1027_p5 = scmp.ge.s32.totalorder %s1162_s14, 1  ;;  %p257_p6 = scmp.lt.s32.totalorder %s1162_s14, 3 }
  0x19   : > { %p258_p7 = pnand %p1027_p5, %p257_p6 }
  0x1a   : > { %v1232_v9 = vld [vmem:[%s1319_s1 + $0x4] ss:$12 sps:$4 sm:$0xff] (!%p258_p7)   ;;  %v1237_v10 = vld [vmem:[%s1319_s1] ss:$12 sps:$4 sm:$0xff] (!%p258_p7)   ;;  %s1164_s4 = smov (!%p258_p7), 117   ;;  %v1165_v12 = vmov (!%p258_p7), 0  }
  0x1b   : > { %261 = sbr.rel (%p258_p7) target bundleno = 421 (0x1a5), region = 69  ;;  %598 = vrot.lane.b32.xlu0 (!%p258_p7), %v1232_v9, %s1164_s4  ;;  %v1130_v11 = vld [vmem:[%s1319_s1 + $0x8] ss:$12 sps:$4 sm:$0xff] (!%p258_p7)   ;;  %596 = vrot.lane.b32.xlu1 (!%p258_p7), %v1237_v10, %s1164_s4  ;;  %s264_s7 = sand.u32 (!%p258_p7), 1, %s1154_s12   ;;  %vm602_vm0 = vcmask (!%p258_p7), 957440   ;;  %vm354_vm1 = vcmask (!%p258_p7), 1039360  }
  0x1c   : > { %642 = vmatprep.mubr.bf16.mxu0 (!%p258_p7), %v1165_v12  ;;  %395 = vmatprep.mubr.bf16.mxu1 (!%p258_p7), %v1165_v12  ;;  %s1091_s8 = smul.u32 (!%p258_p7), 72, %s264_s7  ;;  %s1166_s9 = smov (!%p258_p7), 127   ;;  %vm359_vm2 = vcmask (!%p258_p7), 130048   ;;  %vm668_vm3 = vcmask (!%p258_p7), 949248   ;;  %vm734_vm4 = vcmask (!%p258_p7), 883712   ;;  %vm470_vm5 = vcmask (!%p258_p7), 1031168  }
  0x1d   : > { %1125 = vset.pattern.permute.xlu0 (!%p258_p7), %v1165_v12  ;;  %1126 = vset.pattern.permute.xlu1 (!%p258_p7), %v1165_v12  ;;  %s1167_s11 = smov (!%p258_p7), 116   ;;  %s1168_s17 = smov (!%p258_p7), 108   ;;  %vm800_vm6 = vcmask (!%p258_p7), 875520   ;;  %vm536_vm7 = vcmask (!%p258_p7), 965632   ;;  %vm866_vm8 = vcmask (!%p258_p7), 867328  }
  0x1e   : > { %s1250_s10 = scalar_lea.vmem (!%p258_p7), [#allocation2], %s1091_s8  ;;  %s1169_s12 = smov (!%p258_p7), 126  }
  0x1f   : > { %600 = vrot.lane.b32.xlu0 (!%p258_p7), %v1130_v11, %s1164_s4  ;;  %350 = vrot.lane.b32.xlu1 (!%p258_p7), %v1232_v9, %s1166_s9  ;;  %s1170_s18 = smov (!%p258_p7), 107   ;;  %s1171_s20 = smov (!%p258_p7), 118   ;;  %v1131_v21 = vld [vmem:[%s1250_s10 + $0x20] sm:$0xff] (!%p258_p7)   ;;  %v1132_v29 = vld [vmem:[%s1250_s10 + $0x8] sm:$0xff] (!%p258_p7)  }
  0x20   : > { %s1172_s21 = smov (!%p258_p7), 106   ;;  %s1028_s22 = sshll.u32 (!%p258_p7), %s1021_s15, 1  ;;  %v1133_v33 = vld [vmem:[%s1250_s10 + $0x28] sm:$0xff] (!%p258_p7)   ;;  %v1134_v40 = vld [vmem:[%s1250_s10] sm:$0xff] (!%p258_p7)   ;;  %v1135_v44 = vld [vmem:[%s1250_s10 + $0x30] sm:$0xff] (!%p258_p7)  }
  0x21   : > { %p295_p8 = scmp.lt.s32.totalorder (!%p258_p7), %s1028_s22, 3  ;;  %v1136_v52 = vld [vmem:[%s1250_s10 + $0x10] sm:$0xff] (!%p258_p7)   ;;  %v1137_v56 = vld [vmem:[%s1250_s10 + $0x38] sm:$0xff] (!%p258_p7)   ;;  %v1139_v63 = vld [vmem:[%s1250_s10 + $0x40] sm:$0xff] (!%p258_p7)  }
  0x22   : > { %v1138_v62 = vld [vmem:[%s1250_s10 + $0x18] sm:$0xff]  }
  0x23   : > { %352 = vrot.lane.b32.xlu0 %v1130_v11, %s1166_s9  ;;  %664 = vrot.lane.b32.xlu1 %v1232_v9, %s1167_s11  ;;  %s1326_s22 = smov (!%p295_p8, %s1028_s22), 3 }
  0x24   : > { %s1029_s23 = sshll.u32 %s1326_s22, 3  ;;  %s1057_s14 = sshll.u32 %s1326_s22, 4 }
  0x25   : > { %s298_s26 = scalar_lea.vmem %s1320_s2, %s1029_s23  ;;  %s305_s28 = scalar_lea.vmem %s1321_s3, %s1057_s14 }
  0x26   : > { %v921_v13 = vld [vmem:[%s298_s26] sm:$0xff]  ;;  %v922_v14 = vld [vmem:[%s298_s26 + $0x8] sm:$0xff] }
  0x27   : > { %666 = vrot.lane.b32.xlu0 %v1130_v11, %s1167_s11  ;;  %348 = vrot.lane.b32.xlu1 %v1237_v10, %s1166_s9 }
  0x2b   : > { %662 = vrot.lane.b32.xlu0 %v1237_v10, %s1167_s11  ;;  %730 = vrot.lane.b32.xlu1 %v1232_v9, %s1168_s17 }
  0x2f   : > { %732 = vrot.lane.b32.xlu0 %v1130_v11, %s1168_s17  ;;  %728 = vrot.lane.b32.xlu1 %v1237_v10, %s1168_s17 }
  0x33   : > { %466 = vrot.lane.b32.xlu0 %v1232_v9, %s1169_s12  ;;  %468 = vrot.lane.b32.xlu1 %v1130_v11, %s1169_s12 }
  0x37   : > { %796 = vrot.lane.b32.xlu0 %v1232_v9, %s1170_s18  ;;  %798 = vrot.lane.b32.xlu1 %v1130_v11, %s1170_s18 }
  0x3b   : > { %464 = vrot.lane.b32.xlu0 %v1237_v10, %s1169_s12  ;;  %794 = vrot.lane.b32.xlu1 %v1237_v10, %s1170_s18 }
  0x3f   : > { %532 = vrot.lane.b32.xlu0 %v1232_v9, %s1171_s20  ;;  %534 = vrot.lane.b32.xlu1 %v1130_v11, %s1171_s20 }
  0x43   : > { %862 = vrot.lane.b32.xlu0 %v1232_v9, %s1172_s21  ;;  %864 = vrot.lane.b32.xlu1 %v1130_v11, %s1172_s21 }
  0x47   : > { %530 = vrot.lane.b32.xlu0 %v1237_v10, %s1171_s20  ;;  %860 = vrot.lane.b32.xlu1 %v1237_v10, %s1172_s21 }
  0x4b   : > { %925 = vperm.xlu0 %1125, %v921_v13   ;;  %930 = vperm.xlu1 %1126, %v922_v14  }
  0x8d   : > { %v599_v15 = vpop.permute.xlu0 %598  ;;  %v597_v16 = vpop.permute.xlu1 %596 }
  0x8e   : > { %v603_v20 = vsel %vm602_vm0, %v597_v16, %v599_v15 }
  0x91   : > { %v601_v17 = vpop.permute.xlu0 %600  ;;  %v351_v18 = vpop.permute.xlu1 %350 }
  0x92   : > { %v604_v19 = vsel %vm602_vm0, %v599_v15, %v601_v17 }
  0x93   : > { %610 = vmatprep.subr.bf16.mxu0 %v604_v19 }
  0x94   : > { %611 = vmatpush1.bf16.msra.mxu0 %v603_v20 }
  0x95   : > { %v353_v22 = vpop.permute.xlu0 %352  ;;  %v665_v23 = vpop.permute.xlu1 %664 }
  0x96   : > { %v356_v24 = vsel %vm354_vm1, %v351_v18, %v353_v22 }
  0x97   : > { %363 = vmatprep.subr.bf16.mxu1 %v356_v24  ;;  %1045 = vmatmul.mubr.msk.bf16.vlgmr.msra.gmra.mrb[0].mxu0 %vm359_vm2, %v1131_v21 }
  0x98   : > { %708 = vmatprep.mubr.bf16.mxu0 %v1165_v12 }
  0x99   : > { %v667_v25 = vpop.permute.xlu0 %666  ;;  %v349_v26 = vpop.permute.xlu1 %348 }
  0x9a   : > { %v670_v27 = vsel %vm668_vm3, %v665_v23, %v667_v25  ;;  %v355_v28 = vsel %vm354_vm1, %v349_v26, %v351_v18 }
  0x9b   : > { %676 = vmatprep.subr.bf16.mxu0 %v670_v27  ;;  %364 = vmatpush1.bf16.msra.mxu1 %v355_v28 }
  0x9c   : > { %416 = vmatprep.subr.bf16.mxu1 %v1232_v9 }
  0x9d   : > { %v663_v30 = vpop.permute.xlu0 %662  ;;  %v731_v32 = vpop.permute.xlu1 %730 }
  0x9e   : > { %v669_v31 = vsel %vm668_vm3, %v663_v30, %v665_v23  ;;  %1037 = vmatmul.mubr.msk.bf16.vlgmr.msra.gmra.mrb[0].mxu1 %vm359_vm2, %v1132_v29 }
  0x9f   : > { %677 = vmatpush1.bf16.msra.mxu0 %v669_v31  ;;  %417 = vmatpush1.bf16.msra.mxu1 %v1237_v10 }
  0xa0   : > { %448 = vmatprep.mubr.bf16.mxu1 %v1165_v12 }
  0xa1   : > { %v733_v34 = vpop.permute.xlu0 %732  ;;  %v729_v35 = vpop.permute.xlu1 %728 }
  0xa2   : > { %v736_v36 = vsel %vm734_vm4, %v731_v32, %v733_v34  ;;  %v735_v37 = vsel %vm734_vm4, %v729_v35, %v731_v32 }
  0xa3   : > { %1047 = vmatmul.mubr.msk.bf16.vlgmr.msra.gmra.mrb[0].mxu0 %vm359_vm2, %v1133_v33  ;;  %742 = vmatprep.subr.bf16.mxu0 %v736_v36 }
  0xa4   : > { %743 = vmatpush1.bf16.msra.mxu0 %v735_v37  ;;  %774 = vmatprep.mubr.bf16.mxu0 %v1165_v12 }
  0xa5   : > { %v467_v38 = vpop.permute.xlu0 %466  ;;  %v469_v39 = vpop.permute.xlu1 %468 }
  0xa6   : > { %v472_v41 = vsel %vm470_vm5, %v467_v38, %v469_v39 }
  0xa7   : > { %478 = vmatprep.subr.bf16.mxu1 %v472_v41 }
  0xa9   : > { %v797_v42 = vpop.permute.xlu0 %796  ;;  %v799_v43 = vpop.permute.xlu1 %798 }
  0xaa   : > { %1039 = vmatmul.mubr.msk.bf16.vlgmr.msra.gmra.mrb[0].mxu1 %vm359_vm2, %v1134_v40  ;;  %v802_v45 = vsel %vm800_vm6, %v797_v42, %v799_v43 }
  0xab   : > { %808 = vmatprep.subr.bf16.mxu0 %v802_v45  ;;  %510 = vmatprep.mubr.bf16.mxu1 %v1165_v12 }
  0xad   : > { %v465_v46 = vpop.permute.xlu0 %464  ;;  %v795_v48 = vpop.permute.xlu1 %794 }
  0xae   : > { %v471_v47 = vsel %vm470_vm5, %v465_v46, %v467_v38  ;;  %v801_v49 = vsel %vm800_vm6, %v795_v48, %v797_v42 }
  0xaf   : > { %479 = vmatpush1.bf16.msra.mxu1 %v471_v47  ;;  %1049 = vmatmul.mubr.msk.bf16.vlgmr.msra.gmra.mrb[0].mxu0 %vm359_vm2, %v1135_v44 }
  0xb0   : > { %809 = vmatpush1.bf16.msra.mxu0 %v801_v49  ;;  %840 = vmatprep.mubr.bf16.mxu0 %v1165_v12 }
  0xb1   : > { %v533_v50 = vpop.permute.xlu0 %532  ;;  %v535_v51 = vpop.permute.xlu1 %534 }
  0xb2   : > { %v538_v53 = vsel %vm536_vm7, %v533_v50, %v535_v51 }
  0xb3   : > { %544 = vmatprep.subr.bf16.mxu1 %v538_v53 }
  0xb5   : > { %v863_v54 = vpop.permute.xlu0 %862  ;;  %v865_v55 = vpop.permute.xlu1 %864 }
  0xb6   : > { %1041 = vmatmul.mubr.msk.bf16.vlgmr.msra.gmra.mrb[0].mxu1 %vm359_vm2, %v1136_v52  ;;  %v868_v57 = vsel %vm866_vm8, %v863_v54, %v865_v55 }
  0xb7   : > { %874 = vmatprep.subr.bf16.mxu0 %v868_v57  ;;  %576 = vmatprep.mubr.bf16.mxu1 %v1165_v12 }
  0xb9   : > { %v531_v58 = vpop.permute.xlu0 %530  ;;  %v861_v60 = vpop.permute.xlu1 %860 }
  0xba   : > { %v537_v59 = vsel %vm536_vm7, %v531_v58, %v533_v50  ;;  %v867_v61 = vsel %vm866_vm8, %v861_v60, %v863_v54 }
  0xbb   : > { %545 = vmatpush1.bf16.msra.mxu1 %v537_v59  ;;  %1051 = vmatmul.mubr.msk.bf16.vlgmr.msra.gmra.mrb[0].mxu0 %vm359_vm2, %v1137_v56 }
  0xbc   : > { %875 = vmatpush1.bf16.msra.mxu0 %v867_v61  ;;  %906 = vmatprep.mubr.bf16.mxu0 %v1165_v12 }
  0xc2   : > { %1043 = vmatmul.mubr.msk.bf16.vlgmr.msra.gmra.mrb[0].mxu1 %vm359_vm2, %v1138_v62 }
  0xc7   : > { %1053 = vmatmul.mubr.msk.bf16.vlgmr.msra.gmra.mrb[0].mxu0 %vm359_vm2, %v1139_v63 }
  0xca   : > { %v926_v5 = vpop.permute.xlu0 %925  ;;  %v931_v10 = vpop.permute.xlu1 %930 }
 0x195   : > { %v578_v0 = vpop.f32.mrb[0].mxu1 }
 0x196   : > { %v580_v1 = vpop.f32.mrb[1].mxu1 }
 0x197   : > { %v582_v2 = vpop.f32.mrb[2].mxu1 }
 0x198   : > { %v584_v3 = vpop.f32.mrb[3].mxu1 }
 0x19a   : > { %v908_v4 = vpop.f32.mrb[0].mxu0 }
 0x19b   : > { %v1058_v6 = vadd.f32 %v908_v4, %v578_v0  ;;  %v910_v7 = vpop.f32.mrb[1].mxu0 }
 0x19c   : > { %v1059_v8 = vadd.f32 %v910_v7, %v580_v1  ;;  %v912_v9 = vpop.f32.mrb[2].mxu0 }
 0x19d   : > { %v933_v11 = vadd.f32 %v1058_v6, %v926_v5  ;;  %v1060_v12 = vadd.f32 %v912_v9, %v582_v2  ;;  %v914_v13 = vpop.f32.mrb[3].mxu0 }
 0x19e   : > { %v934_v14 = vadd.f32 %v1059_v8, %v926_v5  ;;  %v1061_v15 = vadd.f32 %v914_v13, %v584_v3 }
 0x19f   : > { %v937_v16 = vmax.f32 %v933_v11, 0.0  ;;  %v935_v17 = vadd.f32 %v1060_v12, %v931_v10 }
 0x1a0   : > { %v938_v18 = vmax.f32 %v934_v14, 0.0  ;;  %v936_v19 = vadd.f32 %v1061_v15, %v931_v10 }
 0x1a1   : > { %941 = vst [vmem:[%s305_s28] sm:$0xff] %v937_v16  ;;  %v939_v20 = vmax.f32 %v935_v17, 0.0 }
 0x1a2   : > { %942 = vst [vmem:[%s305_s28 + $0x8] sm:$0xff] %v938_v18  ;;  %v940_v21 = vmax.f32 %v936_v19, 0.0 }
 0x1a3   : > { %943 = vst [vmem:[%s305_s28 + $0x10] sm:$0xff] %v939_v20 }
 0x1a4   : > { %944 = vst [vmem:[%s305_s28 + $0x18] sm:$0xff] %v940_v21 }
 0x1a5 PF: > { %p10_p9 = scmp.ge.s32.totalorder %s1210_s16, 4   ;;  %s1322_s12 = smov %s1158_s13 }
 0x1a6   : > { %s1323_s13 = smov %s1219_s19  ;;  %s1324_s14 = smov %s1210_s16 }
 0x1a7   :  { %12 = sbr.rel (!%p10_p9) target bundleno = 2 (0x2), region = 111 }

</bundles_post_ra>
